<compile_context>
chip_gen: v7x
topology: tpu7x:2x2x1
jax: 0.10.0
libtpu: 0.0.40
codegen_flags: <defaults>
</compile_context>

<pallas_src>
import functools
import math

import jax
import jax.numpy as jnp
from jax.experimental import pallas as pl
from jax.experimental.pallas import tpu as pltpu

EPS = 1e-6


# ---------------------------------------------------------------------------
# Kernel
# ---------------------------------------------------------------------------
def _layer_norm_kernel(x_ref, ab_ref, o_ref, *, d):
    """One (TILE_R, D) row tile: one-pass stats -> per-row scale/shift -> store."""
    x = x_ref[...].astype(jnp.float32)                  # (TILE_R, D), stats in f32
    alpha = ab_ref[0]
    beta = ab_ref[1]

    # One-pass statistics: no (TILE_R, D) f32 `centered` temp materialized.
    s1 = jnp.sum(x, axis=-1, keepdims=True)             # (TILE_R, 1)
    s2 = jnp.sum(x * x, axis=-1, keepdims=True)         # (TILE_R, 1)
    mean = s1 * (1.0 / d)
    # torch.std default is unbiased -> divide by (D - 1); clamp vs cancellation.
    var = jnp.maximum((s2 - mean * s1) * (1.0 / (d - 1)), 0.0)

    denom = jnp.sqrt(var) + EPS
    # EUP approx reciprocal + one Newton step (per-row column -> negligible VALU).
    inv = pl.reciprocal(denom, approx=True)
    inv = inv * (2.0 - denom * inv)

    scale = alpha * inv                                  # (TILE_R, 1)
    shift = beta - mean * scale                          # (TILE_R, 1)
    o_ref[...] = (x * scale + shift).astype(o_ref.dtype)


# ---------------------------------------------------------------------------
# Wrapper
# ---------------------------------------------------------------------------
def _vmem_capacity_bytes():
    try:
        return int(pltpu.get_tpu_info().vmem_capacity_bytes)
    except Exception:
        return 128 * 1024 * 1024


def layer_norm(x, alpha, bias, *, block_rows=None):
    """LayerNormalization over the last axis of `x` with scalar alpha/bias."""
    orig_shape = x.shape
    d = orig_shape[-1]
    r = math.prod(orig_shape[:-1]) if len(orig_shape) > 1 else 1
    x2 = x.reshape(r, d)
    itemsize = jnp.dtype(x.dtype).itemsize

    # Generation-aware VMEM budget (v7x only has 64 MiB per TC).
    cap = _vmem_capacity_bytes()
    if cap <= 64 * 1024 * 1024:
        vmem_budget = min((cap * 3) // 4, 56 * 1024 * 1024)
    else:
        vmem_budget = min(96 * 1024 * 1024, cap - 16 * 1024 * 1024)

    if block_rows is None:
        # Per-row footprint: 2x double-buffered input + 2x output block (native
        # dtype) + ~2 (tile, D) f32 intermediates inside the kernel body.
        per_row_footprint = d * (4 * itemsize + 2 * 4)
        rows_by_budget = max(8, vmem_budget // max(1, per_row_footprint))
        # Target ~8 MiB blocks; bigger gives only marginal per-step amortization.
        rows_by_bytes = max(8, (8 * 1024 * 1024) // max(1, d * itemsize))
        block_rows = min(rows_by_budget, rows_by_bytes)

    if r <= block_rows:
        tile = r                                 # block == full array dims -> legal
    else:
        tile = max(8, (block_rows // 8) * 8)     # multiple of 8; last block masked

    grid = (pl.cdiv(r, tile),)                   # no padding / slicing in HBM

    # Scalar alpha / bias packed into a small 1-D SMEM array.
    ab = jnp.stack([jnp.asarray(alpha, jnp.float32).reshape(()),
                    jnp.asarray(bias, jnp.float32).reshape(())])

    cost = pl.CostEstimate(
        flops=5 * r * d,
        transcendentals=2 * r,
        bytes_accessed=2 * r * d * itemsize,
    )

    out = pl.pallas_call(
        functools.partial(_layer_norm_kernel, d=d),
        out_shape=jax.ShapeDtypeStruct((r, d), x.dtype),
        grid=grid,
        in_specs=[
            pl.BlockSpec((tile, d), lambda i: (i, 0)),           # row tile of x
            pl.BlockSpec(memory_space=pltpu.MemorySpace.SMEM),   # [alpha, bias]
        ],
        out_specs=pl.BlockSpec((tile, d), lambda i: (i, 0)),
        compiler_params=pltpu.CompilerParams(
            dimension_semantics=("parallel",),
            vmem_limit_bytes=int(vmem_budget),
        ),
        cost_estimate=cost,
    )(x2, ab)

    return out.reshape(orig_shape)


# ---------------------------------------------------------------------------
# Pure-JAX reference (torch semantics: unbiased std, divide by std + eps)
# ---------------------------------------------------------------------------
def _layer_norm_ref(x, alpha, bias):
    xf = x.astype(jnp.float32)
    mean = xf.mean(-1, keepdims=True)
    var = ((xf - mean) ** 2).sum(-1, keepdims=True) / (xf.shape[-1] - 1)
    std = jnp.sqrt(var)
    return (alpha * (xf - mean) / (std + EPS) + bias).astype(x.dtype)


# ---------------------------------------------------------------------------
if __name__ == "__main__":
    key = jax.random.PRNGKey(0)
    k1, k2 = jax.random.split(key)

    # Small shape consistent with transformer-style usage: (batch, seq, d_model)
    B, S, D = 2, 8, 32
    x = jax.random.normal(k1, (B, S, D), jnp.float32)
    alpha = jnp.float32(1.0)    # torch.ones(1)
    bias = jnp.float32(0.0)     # torch.zeros(1)

    out = jax.block_until_ready(jax.jit(layer_norm)(x, alpha, bias))
    ref = _layer_norm_ref(x, alpha, bias)
    assert out.shape == x.shape
    assert jnp.allclose(out, ref, atol=2e-5, rtol=2e-5), \
        float(jnp.max(jnp.abs(out - ref)))

    # Second case: rows (300) not a multiple of the 64-row tile -> exercises the
    # masked partial last block (no wrapper pad/slice), lane-dense D=128, and
    # non-default scalar parameters.
    x2 = jax.random.normal(k2, (3, 100, 128), jnp.float32)
    a2 = jnp.float32(0.75)
    b2 = jnp.float32(-0.25)
    out2 = jax.block_until_ready(
        jax.jit(functools.partial(layer_norm, block_rows=64))(x2, a2, b2))
    ref2 = _layer_norm_ref(x2, a2, b2)
    assert jnp.allclose(out2, ref2, atol=2e-5, rtol=2e-5), \
        float(jnp.max(jnp.abs(out2 - ref2)))

    print("KERNEL_OK")
</pallas_src>

<mosaic_0001>
module attributes {stable_mosaic.version = 11 : i64} {
  func.func @_layer_norm_kernel(%arg0: i32, %arg1: memref<16x32xf32, #tpu.memory_space<vmem>>, %arg2: memref<2xf32, #tpu.memory_space<smem>>, %arg3: memref<16x32xf32, #tpu.memory_space<vmem>>) attributes {dimension_semantics = [#tpu.dimension_semantics<parallel>], iteration_bounds = array<i64: 1>, scalar_prefetch = 0 : i64, scratch_operands = 0 : i64, tpu.core_type = #tpu.core_type<tc>, window_params = [{transform_indices = @transform_0, window_bounds = array<i64: 16, 32>}, {transform_indices = @transform_1, window_bounds = array<i64: 2>}, {transform_indices = @transform_2, window_bounds = array<i64: 16, 32>}]} {
    %c0 = arith.constant 0 : index
    %c0_0 = arith.constant 0 : index
    %0 = vector.load %arg1[%c0, %c0_0] : memref<16x32xf32, #tpu.memory_space<vmem>>, vector<16x32xf32>
    %c0_1 = arith.constant 0 : index
    %1 = memref.load %arg2[%c0_1] : memref<2xf32, #tpu.memory_space<smem>>
    %c1 = arith.constant 1 : index
    %2 = memref.load %arg2[%c1] : memref<2xf32, #tpu.memory_space<smem>>
    %cst = arith.constant dense<0.000000e+00> : vector<16xf32>
    %3 = vector.multi_reduction <add>, %0, %cst [1] : vector<16x32xf32> to vector<16xf32>
    %4 = vector.shape_cast %3 : vector<16xf32> to vector<16x1xf32>
    %5 = arith.mulf %0, %0 : vector<16x32xf32>
    %cst_2 = arith.constant dense<0.000000e+00> : vector<16xf32>
    %6 = vector.multi_reduction <add>, %5, %cst_2 [1] : vector<16x32xf32> to vector<16xf32>
    %7 = vector.shape_cast %6 : vector<16xf32> to vector<16x1xf32>
    %cst_3 = arith.constant 3.125000e-02 : f32
    %8 = vector.broadcast %cst_3 : f32 to vector<16x1xf32>
    %9 = arith.mulf %4, %8 : vector<16x1xf32>
    %10 = arith.mulf %9, %4 : vector<16x1xf32>
    %11 = arith.subf %7, %10 : vector<16x1xf32>
    %cst_4 = arith.constant 0.0322580636 : f32
    %12 = vector.broadcast %cst_4 : f32 to vector<16x1xf32>
    %13 = arith.mulf %11, %12 : vector<16x1xf32>
    %cst_5 = arith.constant 0.000000e+00 : f32
    %14 = vector.broadcast %cst_5 : f32 to vector<16x1xf32>
    %15 = arith.maximumf %13, %14 : vector<16x1xf32>
    %16 = math.sqrt %15 : vector<16x1xf32>
    %cst_6 = arith.constant 9.99999997E-7 : f32
    %17 = vector.broadcast %cst_6 : f32 to vector<16x1xf32>
    %18 = arith.addf %16, %17 : vector<16x1xf32>
    %19 = tpu.reciprocal %18 {approx = true} : vector<16x1xf32> -> vector<16x1xf32>
    %20 = arith.mulf %18, %19 : vector<16x1xf32>
    %cst_7 = arith.constant 2.000000e+00 : f32
    %21 = vector.broadcast %cst_7 : f32 to vector<16x1xf32>
    %22 = arith.subf %21, %20 : vector<16x1xf32>
    %23 = arith.mulf %19, %22 : vector<16x1xf32>
    %24 = vector.broadcast %1 : f32 to vector<16x1xf32>
    %25 = arith.mulf %24, %23 : vector<16x1xf32>
    %26 = arith.mulf %9, %25 : vector<16x1xf32>
    %27 = vector.broadcast %2 : f32 to vector<16x1xf32>
    %28 = arith.subf %27, %26 : vector<16x1xf32>
    %29 = vector.broadcast %25 : vector<16x1xf32> to vector<16x32xf32>
    %30 = arith.mulf %0, %29 : vector<16x32xf32>
    %31 = vector.broadcast %28 : vector<16x1xf32> to vector<16x32xf32>
    %32 = arith.addf %30, %31 : vector<16x32xf32>
    %c0_8 = arith.constant 0 : index
    %c0_9 = arith.constant 0 : index
    %33 = vector.load %arg3[%c0_8, %c0_9] : memref<16x32xf32, #tpu.memory_space<vmem>>, vector<16x32xf32>
    tpu.vector_store %arg3[%c0_8, %c0_9], %32 {strides = array<i32>} : memref<16x32xf32, #tpu.memory_space<vmem>>, vector<16x32xf32>,
    return
  }
  func.func @transform_0(%arg0: i32) -> (i32, i32) {
    %c0_i32 = arith.constant 0 : i32
    %c0_i32_0 = arith.constant 0 : i32
    return %arg0, %c0_i32 : i32, i32
  }
  func.func @transform_1(%arg0: i32) -> i32 {
    %c0_i32 = arith.constant 0 : i32
    %c0_i32_0 = arith.constant 0 : i32
    return %c0_i32 : i32
  }
  func.func @transform_2(%arg0: i32) -> (i32, i32) {
    %c0_i32 = arith.constant 0 : i32
    %c0_i32_0 = arith.constant 0 : i32
    return %arg0, %c0_i32 : i32, i32
  }
}

</mosaic_0001>

<bundles_post_ra>
// kernel: layer_norm.1
= control target key start
LH: loop header
LB: loop body
LE: loop exit
PB: predicated region body
PF: predicated region fallthrough
CT: control target
= control target key end

     0   :  { %7 = vsyncpa [#allocation3], 0  ;;  %s276_s0 = inlined_call_operand.hbm [shape: f32[16,32], index: 0, kind: input, shape index: {}]   ;;  %s277_s1 = inlined_call_operand.hbm [shape: f32[2], index: 1, kind: input, shape index: {}]   ;;  %s278_s2 = inlined_call_operand.hbm [shape: f32[16,32], index: 2, kind: output, shape index: {}]  }
   0x1   :  { %8 = vsyncpa [#allocation5], 0 }
   0x2   :  { %9 = vsyncpa [#allocation4], 0  ;;  %s196_s9 = smov [#allocation2]   ;;  %s136_s13 = scalar_lea.hbm %s276_s0, 256 }
   0x3   :  { %s15_s10 = sshll.u32 %s196_s9, 4  ;;  %p137_p0 = scmp.ne.s32.totalorder %s276_s0, %s136_s13  ;;  %s16_s10 = int_to_ptr.vmem [resolvable:$true] %s15_s10 }
   0x4   :  { %p140_p1 = scmp.lt.u32.totalorder %s136_s13, %s276_s0 }
   0x6   :  { %p142_p2 = pnand %p140_p1, %p137_p0 }
   0x8   :  { %145 = shalt.err (!%p142_p2)
}
   0x9   :  { %s146_s18 = scalar_lea.vmem %s16_s10, 256  ;;  %p151_p4 = scmp.lt.s32.totalorder %s16_s10, %s16_s10 }
   0xa   :  { %p147_p3 = scmp.ne.s32.totalorder %s16_s10, %s146_s18  ;;  %p152_p5 = scmp.lt.s32.totalorder %s146_s18, %s146_s18 }
   0xc   :  { %p153_p6 = por %p152_p5, %p151_p4 }
   0xe   :  { %p154_p7 = pnand %p153_p6, %p147_p3 }
  0x10   :  { %157 = shalt.err (!%p154_p7)
}
  0x11   :  { %s197_s19 = smov 128   ;;  %s198_s20 = smov 8  }
  0x12   :  { %21 = dma.hbm_to_vmem [thread:$0]  %s276_s0, 256, %s16_s10, [#allocation3], %s197_s19, %s197_s19, %s198_s20  }
  0x13   :  { %s158_s25 = scalar_lea.hbm %s277_s1, 16 }
  0x14   :  { %p159_p8 = scmp.ne.s32.totalorder %s277_s1, %s158_s25  ;;  %p162_p9 = scmp.lt.u32.totalorder %s158_s25, %s277_s1 }
  0x16   :  { %p164_p10 = pnand %p162_p9, %p159_p8 }
  0x18   :  { %167 = shalt.err (!%p164_p10)
}
  0x19   :  { %s199_s30 = smov [#allocation6]  }
  0x1a   :  { %29 = dma.hbm_to_smem %s277_s1, 16, %s199_s30, [#allocation5]  }
  0x1b   :  { %190 = dma.done.wait [#allocation3], 256  }
  0x1c   :  { %191 = vsyncadd [#allocation3], 4294967040 }
  0x1d   :  { %192 = dma.done.wait [#allocation5], 16  }
  0x1e   :  { %193 = vsyncadd [#allocation5], 4294967280 }
  0x1f   :  { %36 = sfence }
  0x20   :  { %v243_v0 = vld [vmem:[#allocation2] sm:$0xff]  ;;  %vm41_vm0 = vcmask 261120   ;;  %v245_v1 = vld [vmem:[#allocation2 + $0x8] sm:$0xff]  ;;  %s39_s0 = sld [smem:[#allocation6]]  ;;  %s122_s1 = sld [smem:[#allocation6 + $0x1]] }
  0x21   :  { %v42_v2 = vsel %vm41_vm0, %v243_v0, 0.0  ;;  %v48_v3 = vmul.f32 %v243_v0, %v243_v0  ;;  %v49_v4 = vmul.f32 %v245_v1, %v245_v1  ;;  %v45_v6 = vsel %vm41_vm0, %v245_v1, 0.0  ;;  %s200_s5 = smov [#allocation7]  }
  0x22   :  { %43 = vadd.xlane.f32.xlu0 %v42_v2  ;;  %s109_s6 = sshll.u32 %s200_s5, 4  ;;  %s110_s6 = int_to_ptr.vmem [resolvable:$true] %s109_s6 }
  0x23   :  { %v50_v5 = vsel %vm41_vm0, %v48_v3, 0.0  ;;  %v53_v7 = vsel %vm41_vm0, %v49_v4, 0.0  ;;  %s168_s7 = scalar_lea.vmem %s110_s6, 256  ;;  %p173_p12 = scmp.lt.s32.totalorder %s110_s6, %s110_s6 }
  0x24   :  { %51 = vadd.xlane.f32.xlu1 %v50_v5  ;;  %p169_p11 = scmp.ne.s32.totalorder %s110_s6, %s168_s7  ;;  %p174_p13 = scmp.lt.s32.totalorder %s168_s7, %s168_s7 }
  0x26   :  { %46 = vadd.xlane.f32.xlu0 %v45_v6  ;;  %v90_v38 = vstv %s39_s0  ;;  %v95_v43 = vstv %s122_s1  ;;  %p175_p0 = por %p174_p13, %p173_p12 }
  0x28   :  { %54 = vadd.xlane.f32.xlu1 %v53_v7  ;;  %p176_p1 = pnand %p175_p0, %p169_p11 }
  0xaf   :  { %v44_v8 = vpop.xlane.xlu0 %43 }
  0xb0   :  { %v56_v9 = vmul.f32 0.03125, %v44_v8 }
  0xb1   :  { %v52_v10 = vpop.xlane.xlu1 %51 }
  0xb2   :  { %v58_v11 = vmul.f32 %v56_v9, %v44_v8 }
  0xb3   :  { %v47_v12 = vpop.xlane.xlu0 %46 }
  0xb4   :  { %v60_v13 = vsub.f32 %v52_v10, %v58_v11  ;;  %v57_v14 = vmul.f32 0.03125, %v47_v12 }
  0xb5   :  { %v55_v15 = vpop.xlane.xlu1 %54 }
  0xb6   :  { %v62_v16 = vmul.f32 0.032258064, %v60_v13  ;;  %v59_v17 = vmul.f32 %v57_v14, %v47_v12 }
  0xb8   :  { %v64_v18 = vmax.f32 %v62_v16, 0.0  ;;  %v61_v19 = vsub.f32 %v55_v15, %v59_v17 }
  0xba   :  { %128 = vrsqrt.f32 %v64_v18  ;;  %v63_v20 = vmul.f32 0.032258064, %v61_v19  ;;  %vm68_vm1 = vcmp.eq.f32.partialorder %v64_v18, inf  ;;  %v71_v24 = vand.u32 2147483648, %v64_v18 }
  0xbb   :  { %vm70_vm2 = vcmp.eq.f32.partialorder %v64_v18, 0.0 }
  0xbc   :  { %v65_v21 = vmax.f32 %v63_v20, 0.0 }
  0xbe   :  { %130 = vrsqrt.f32 %v65_v21  ;;  %vm75_vm3 = vcmp.eq.f32.partialorder %v65_v21, inf  ;;  %v78_v30 = vand.u32 2147483648, %v65_v21  ;;  %vm77_vm4 = vcmp.eq.f32.partialorder %v65_v21, 0.0 }
  0xc4   :  { %v129_v22 = vpop.eup %128 }
  0xc5   :  { %v67_v23 = vmul.f32 %v129_v22, %v64_v18 }
  0xc7   :  { %v69_v25 = vsel %vm68_vm1, %v64_v18, %v67_v23 }
  0xc8   :  { %v131_v26 = vpop.eup %130  ;;  %v72_v27 = vsel %vm70_vm2, %v71_v24, %v69_v25 }
  0xc9   :  { %v74_v28 = vmul.f32 %v131_v26, %v65_v21  ;;  %v80_v29 = vadd.f32 1e-06, %v72_v27 }
  0xcb   :  { %v76_v31 = vsel %vm75_vm3, %v65_v21, %v74_v28  ;;  %132 = vrcp.f32 %v80_v29 }
  0xcc   :  { %v79_v32 = vsel %vm77_vm4, %v78_v30, %v76_v31 }
  0xcd   :  { %v81_v33 = vadd.f32 1e-06, %v79_v32 }
  0xcf   :  { %134 = vrcp.f32 %v81_v33 }
  0xd5   :  { %v133_v34 = vpop.eup %132 }
  0xd6   :  { %v84_v35 = vmul.f32 %v133_v34, %v80_v29 }
  0xd8   :  { %v86_v36 = vsub.f32 2.0, %v84_v35 }
  0xd9   :  { %v135_v37 = vpop.eup %134 }
  0xda   :  { %v85_v39 = vmul.f32 %v135_v37, %v81_v33  ;;  %v88_v40 = vmul.f32 %v133_v34, %v86_v36 }
  0xdc   :  { %v87_v41 = vsub.f32 2.0, %v85_v39  ;;  %v91_v42 = vmul.f32 %v90_v38, %v88_v40 }
  0xde   :  { %v89_v44 = vmul.f32 %v135_v37, %v87_v41  ;;  %v93_v45 = vmul.f32 %v91_v42, %v56_v9  ;;  %v98_v48 = vmul.f32 %v91_v42, %v243_v0 }
  0xe0   :  { %v92_v46 = vmul.f32 %v90_v38, %v89_v44  ;;  %v96_v47 = vsub.f32 %v95_v43, %v93_v45 }
  0xe2   :  { %v94_v49 = vmul.f32 %v92_v46, %v57_v14  ;;  %v100_v50 = vadd.f32 %v98_v48, %v96_v47  ;;  %v99_v52 = vmul.f32 %v92_v46, %v245_v1 }
  0xe4   :  { %v97_v51 = vsub.f32 %v95_v43, %v94_v49  ;;  %102 = vst.msk [vmem:[#allocation7] sm:$0xff] %vm41_vm0, %v100_v50 }
  0xe6   :  { %v101_v53 = vadd.f32 %v99_v52, %v97_v51 }
  0xe8   :  { %103 = vst.msk [vmem:[#allocation7 + $0x8] sm:$0xff] %vm41_vm0, %v101_v53 }
  0xe9   :  { %179 = shalt.err (!%p176_p1)
}
  0xea   :  { %s180_s10 = scalar_lea.hbm %s278_s2, 256 }
  0xeb   :  { %p181_p2 = scmp.ne.s32.totalorder %s278_s2, %s180_s10  ;;  %p184_p3 = scmp.lt.u32.totalorder %s180_s10, %s278_s2 }
  0xed   :  { %p186_p4 = pnand %p184_p3, %p181_p2 }
  0xef   :  { %189 = shalt.err (!%p186_p4)
}
  0xf0   :  { %115 = dma.vmem_to_hbm [thread:$0]  %s110_s6, 256, %s278_s2, [#allocation4], %s197_s19, %s197_s19, %s198_s20  }
  0xf1   :  { %194 = dma.done.wait [#allocation4], 256  }
  0xf2   :  { %195 = vsyncadd [#allocation4], 4294967040 }
  0xf3   :  { %119 = vsyncpa [#allocation3], 1 }
  0xf4   :  { %120 = vsyncpa [#allocation4], 1 }
  0xf5   :  { %121 = vsyncpa [#allocation5], 1 }

</bundles_post_ra>
